<compile_context>
chip_gen: v6e
topology: v6e:2x2x1
jax: 0.10.0
libtpu: 0.0.40
codegen_flags: <defaults>
</compile_context>

<pallas_src>
import math
from functools import partial

import jax
import jax.numpy as jnp
from jax.experimental import pallas as pl
from jax.experimental.pallas import tpu as pltpu


def _round_up(x, m):
    return ((x + m - 1) // m) * m


def _balanced_tile(dim, max_tile, granule):
    """Tile size <= max_tile, granule-aligned, minimizing padding waste."""
    if dim <= granule:
        return granule
    if dim <= max_tile:
        return _round_up(dim, granule)
    n_tiles = math.ceil(dim / max_tile)
    tile = _round_up(math.ceil(dim / n_tiles), granule)
    return min(tile, _round_up(dim, granule))


def _fc_kernel(x_ref, w_ref, b_ref, y_ref, acc_ref, *, compute_dtype):
    k = pl.program_id(2)

    @pl.when(k == 0)
    def _():
        # Fuse the bias into the accumulator init (saves the epilogue add).
        acc_ref[...] = jnp.zeros_like(acc_ref) + b_ref[...].astype(jnp.float32)

    # x tile (tm, tk) . w tile (tk, tn) -> (tm, tn); weight was transposed to
    # (K, N) once at prep time, so this is the plain MXU-friendly NN matmul.
    acc_ref[...] += jnp.dot(
        x_ref[...].astype(compute_dtype),
        w_ref[...].astype(compute_dtype),
        preferred_element_type=jnp.float32,
    )

    @pl.when(k == pl.num_programs(2) - 1)
    def _():
        y_ref[...] = acc_ref[...].astype(y_ref.dtype)


def prepare_fc_params(weight, bias, *, tn_max=512, tk_max=1024):
    """One-time parameter prep: transpose nn.Linear's (N, K) weight to (K, N),
    zero-pad to tile granularity, pad the bias. Amortized across all calls."""
    N, K = weight.shape
    assert bias.shape == (N,), "bias shape mismatch"
    tn = _balanced_tile(N, tn_max, 128)
    tk = _balanced_tile(K, tk_max, 128)
    Np = _round_up(N, tn)
    Kp = _round_up(K, tk)

    wt = weight.T  # (K, N): contraction dim on sublanes -> no per-tile vxpose
    if (Kp, Np) != (K, N):
        wt = jnp.pad(wt, ((0, Kp - K), (0, Np - N)))
    bp = bias.reshape(1, N)
    if Np != N:
        bp = jnp.pad(bp, ((0, 0), (0, Np - N)))
    return {"w": wt, "b": bp, "N": N, "K": K, "tn": tn, "tk": tk}


def fc_xy(x, weight, bias, *, params=None, compute_dtype=jnp.bfloat16,
          tm_max=512, tn_max=512, tk_max=1024,
          force_kernel=False, small_flop_threshold=1 << 24):
    """Pallas equivalent of FC_xy.forward: returns (x, y), y = x @ W.T + b.

    x:      (M, K) float32        weight: (N, K) float32 (PyTorch layout)
    bias:   (N,)   float32        params: output of prepare_fc_params (optional)
    compute_dtype: dtype fed to the MXU (bf16 default; pass jnp.float32 for a
                   bit-accurate-to-f32 path). Accumulation is always f32.
    """
    M, K = x.shape
    N, K2 = weight.shape
    assert K == K2, "weight inner dim mismatch"
    assert bias.shape == (N,), "bias shape mismatch"

    # Tiny problems: a 1-step pallas_call (+ pad/crop) loses to XLA's GEMM.
    if not force_kernel and 2 * M * N * K < small_flop_threshold:
        return (x, x @ weight.T + bias)

    if params is None:
        params = prepare_fc_params(weight, bias, tn_max=tn_max, tk_max=tk_max)
    assert params["N"] == N and params["K"] == K, "params/weight mismatch"

    wp, bp = params["w"], params["b"]
    tn, tk = params["tn"], params["tk"]
    Kp, Np = wp.shape

    tm = _balanced_tile(M, tm_max, 8)
    Mp = _round_up(M, tm)

    # Per-call padding only touches x, and only when actually needed.
    xp = x if (Mp == M and Kp == K) else jnp.pad(x, ((0, Mp - M), (0, Kp - K)))

    grid = (Mp // tm, Np // tn, Kp // tk)   # reduction axis (K) last
    grid_i, grid_j, _ = grid

    # Advisory cost: count HBM re-streaming (x streamed grid_j times, W grid_i).
    flops = 2 * Mp * Np * Kp
    bytes_accessed = 4 * (Mp * Kp * grid_j + Kp * Np * grid_i + Mp * Np + Np)

    # VMEM footprint: double-buffered x/W/out tiles + f32 accumulator + bias.
    vmem_bytes = 4 * (2 * tm * tk + 2 * tk * tn + 2 * tm * tn + tm * tn + 2 * tn)
    # Cap at 48 MiB so the config is safe on v7x (64 MiB physical VMEM / TC).
    vmem_limit = min(48 << 20, max(32 << 20, 2 * vmem_bytes))

    yp = pl.pallas_call(
        partial(_fc_kernel, compute_dtype=compute_dtype),
        out_shape=jax.ShapeDtypeStruct((Mp, Np), x.dtype),
        grid_spec=pltpu.PrefetchScalarGridSpec(
            num_scalar_prefetch=0,
            grid=grid,
            in_specs=[
                pl.BlockSpec((tm, tk), lambda i, j, k: (i, k)),   # x tile
                pl.BlockSpec((tk, tn), lambda i, j, k: (k, j)),   # W.T tile
                pl.BlockSpec((1, tn), lambda i, j, k: (0, j)),    # bias (resident)
            ],
            out_specs=pl.BlockSpec((tm, tn), lambda i, j, k: (i, j)),
            scratch_shapes=[pltpu.VMEM((tm, tn), jnp.float32)],
        ),
        compiler_params=pltpu.CompilerParams(
            # M/N parallel -> dual-TC sharding on v7x; K is the reduction.
            dimension_semantics=("parallel", "parallel", "arbitrary"),
            vmem_limit_bytes=vmem_limit,
        ),
        cost_estimate=pl.CostEstimate(
            flops=flops, transcendentals=0, bytes_accessed=bytes_accessed),
    )(xp, wp, bp)

    y = yp if (Mp == M and Np == N) else yp[:M, :N]
    # Forward returns the input unchanged alongside the linear output.
    return (x, y)


def init_linear_params(key, nn_in, nn_out, dtype=jnp.float32):
    """Deterministic init matching nn.Linear's uniform(-1/sqrt(in), 1/sqrt(in))."""
    kw, kb = jax.random.split(key)
    bound = 1.0 / math.sqrt(nn_in)
    weight = jax.random.uniform(kw, (nn_out, nn_in), dtype, -bound, bound)
    bias = jax.random.uniform(kb, (nn_out,), dtype, -bound, bound)
    return weight, bias


if __name__ == "__main__":
    key = jax.random.PRNGKey(0)
    k_x, k_p = jax.random.split(key)

    batch, nn_in, nn_out = 8, 32, 16
    x = jax.random.normal(k_x, (batch, nn_in), jnp.float32)
    weight, bias = init_linear_params(k_p, nn_in, nn_out)

    # One-time parameter prep (transpose + pad) -- outside the per-call path.
    params = prepare_fc_params(weight, bias)

    # Default path: bf16 MXU feed, f32 accumulation.
    x_out, y_bf16 = fc_xy(x, weight, bias, params=params, force_kernel=True)
    # Precision escape hatch: f32 MXU feed.
    _, y_f32 = fc_xy(x, weight, bias, params=params, force_kernel=True,
                     compute_dtype=jnp.float32)
    jax.block_until_ready((x_out, y_bf16, y_f32))

    # Sanity checks against a plain-JAX reference.
    y_ref = x @ weight.T + bias
    assert x_out.shape == x.shape and y_bf16.shape == (batch, nn_out)
    assert jnp.allclose(x_out, x), "passthrough mismatch"
    assert jnp.allclose(y_f32, y_ref, atol=1e-5, rtol=1e-5), "f32 linear mismatch"
    assert jnp.allclose(y_bf16, y_ref, atol=2e-2, rtol=2e-2), "bf16 linear mismatch"

    print("KERNEL_OK")
</pallas_src>

<mosaic_0001>
module attributes {stable_mosaic.version = 11 : i64} {
  func.func @_fc_kernel(%arg0: i32, %arg1: i32, %arg2: i32, %arg3: memref<8x128xf32, #tpu.memory_space<vmem>>, %arg4: memref<128x128xf32, #tpu.memory_space<vmem>>, %arg5: memref<1x128xf32, #tpu.memory_space<vmem>>, %arg6: memref<8x128xf32, #tpu.memory_space<vmem>>, %arg7: memref<8x128xf32, #tpu.memory_space<vmem>>) attributes {dimension_semantics = [#tpu.dimension_semantics<parallel>, #tpu.dimension_semantics<parallel>, #tpu.dimension_semantics<arbitrary>], iteration_bounds = array<i64: 1, 1, 1>, scalar_prefetch = 0 : i64, scratch_operands = 1 : i64, tpu.core_type = #tpu.core_type<tc>, window_params = [{transform_indices = @transform_0, window_bounds = array<i64: 8, 128>}, {transform_indices = @transform_1, window_bounds = array<i64: 128, 128>}, {transform_indices = @transform_2, window_bounds = array<i64: 1, 128>}, {transform_indices = @transform_3, window_bounds = array<i64: 8, 128>}]} {
    %c0_i32 = arith.constant 0 : i32
    %0 = arith.cmpi eq, %arg2, %c0_i32 : i32
    %1 = arith.extui %0 : i1 to i32
    %c0_i32_0 = arith.constant 0 : i32
    %2 = arith.cmpi ne, %1, %c0_i32_0 : i32
    scf.if %2 {
      %cst_10 = arith.constant 0.000000e+00 : f32
      %14 = vector.broadcast %cst_10 : f32 to vector<8x128xf32>
      %c0_11 = arith.constant 0 : index
      %c0_12 = arith.constant 0 : index
      %15 = vector.load %arg5[%c0_11, %c0_12] : memref<1x128xf32, #tpu.memory_space<vmem>>, vector<1x128xf32>
      %16 = vector.broadcast %15 : vector<1x128xf32> to vector<8x128xf32>
      %17 = arith.addf %14, %16 : vector<8x128xf32>
      %c0_13 = arith.constant 0 : index
      %c0_14 = arith.constant 0 : index
      %18 = vector.load %arg7[%c0_13, %c0_14] : memref<8x128xf32, #tpu.memory_space<vmem>>, vector<8x128xf32>
      tpu.vector_store %arg7[%c0_13, %c0_14], %17 {strides = array<i32>} : memref<8x128xf32, #tpu.memory_space<vmem>>, vector<8x128xf32>,
    } else {
    }
    %c0 = arith.constant 0 : index
    %c0_1 = arith.constant 0 : index
    %3 = vector.load %arg7[%c0, %c0_1] : memref<8x128xf32, #tpu.memory_space<vmem>>, vector<8x128xf32>
    %c0_2 = arith.constant 0 : index
    %c0_3 = arith.constant 0 : index
    %4 = vector.load %arg3[%c0_2, %c0_3] : memref<8x128xf32, #tpu.memory_space<vmem>>, vector<8x128xf32>
    %5 = arith.truncf %4 : vector<8x128xf32> to vector<8x128xbf16>
    %c0_4 = arith.constant 0 : index
    %c0_5 = arith.constant 0 : index
    %6 = vector.load %arg4[%c0_4, %c0_5] : memref<128x128xf32, #tpu.memory_space<vmem>>, vector<128x128xf32>
    %7 = arith.truncf %6 : vector<128x128xf32> to vector<128x128xbf16>
    %cst = arith.constant dense<0.000000e+00> : vector<8x128xf32>
    %8 = tpu.matmul %5, %7, %cst {dimension_numbers = #tpu.dot_dimension_numbers<[1], [0], [0], [1], [0, 0, 1, 1], [], []>} : vector<8x128xbf16>, vector<128x128xbf16>, vector<8x128xf32> -> vector<8x128xf32>
    %9 = arith.addf %3, %8 : vector<8x128xf32>
    %c0_6 = arith.constant 0 : index
    %c0_7 = arith.constant 0 : index
    %10 = vector.load %arg7[%c0_6, %c0_7] : memref<8x128xf32, #tpu.memory_space<vmem>>, vector<8x128xf32>
    tpu.vector_store %arg7[%c0_6, %c0_7], %9 {strides = array<i32>} : memref<8x128xf32, #tpu.memory_space<vmem>>, vector<8x128xf32>,
    %c0_i32_8 = arith.constant 0 : i32
    %11 = arith.cmpi eq, %arg2, %c0_i32_8 : i32
    %12 = arith.extui %11 : i1 to i32
    %c0_i32_9 = arith.constant 0 : i32
    %13 = arith.cmpi ne, %12, %c0_i32_9 : i32
    scf.if %13 {
      %c0_10 = arith.constant 0 : index
      %c0_11 = arith.constant 0 : index
      %14 = vector.load %arg7[%c0_10, %c0_11] : memref<8x128xf32, #tpu.memory_space<vmem>>, vector<8x128xf32>
      %c0_12 = arith.constant 0 : index
      %c0_13 = arith.constant 0 : index
      %15 = vector.load %arg6[%c0_12, %c0_13] : memref<8x128xf32, #tpu.memory_space<vmem>>, vector<8x128xf32>
      tpu.vector_store %arg6[%c0_12, %c0_13], %14 {strides = array<i32>} : memref<8x128xf32, #tpu.memory_space<vmem>>, vector<8x128xf32>,
    } else {
    }
    return
  }
  func.func @transform_0(%arg0: i32, %arg1: i32, %arg2: i32) -> (i32, i32) {
    %c0_i32 = arith.constant 0 : i32
    return %arg0, %arg2 : i32, i32
  }
  func.func @transform_1(%arg0: i32, %arg1: i32, %arg2: i32) -> (i32, i32) {
    %c0_i32 = arith.constant 0 : i32
    return %arg2, %arg1 : i32, i32
  }
  func.func @transform_2(%arg0: i32, %arg1: i32, %arg2: i32) -> (i32, i32) {
    %c0_i32 = arith.constant 0 : i32
    %c0_i32_0 = arith.constant 0 : i32
    return %c0_i32, %arg1 : i32, i32
  }
  func.func @transform_3(%arg0: i32, %arg1: i32, %arg2: i32) -> (i32, i32) {
    %c0_i32 = arith.constant 0 : i32
    return %arg0, %arg1 : i32, i32
  }
}

</mosaic_0001>

<bundles_post_ra>
// kernel: tpu_custom_call.1
= control target key start
LH: loop header
LB: loop body
LE: loop exit
PB: predicated region body
PF: predicated region fallthrough
CT: control target
= control target key end

     0   :  { %8 = vsyncpa [#allocation4], 0  ;;  %s287_s0 = inlined_call_operand.hbm [shape: f32[8,128], index: 0, kind: input, shape index: {}]   ;;  %s288_s1 = inlined_call_operand.hbm [shape: f32[128,128], index: 1, kind: input, shape index: {}]   ;;  %s289_s2 = inlined_call_operand.vmem [shape: f32[1,128], index: 2, kind: input, shape index: {}]   ;;  %s290_s3 = inlined_call_operand.hbm [shape: f32[8,128], index: 3, kind: output, shape index: {}]  }
   0x1   :  { %9 = vsyncpa [#allocation7], 0 }
   0x2   :  { %10 = vsyncpa [#allocation5], 0  ;;  %s248_s12 = smov [#allocation3]   ;;  %s249_s14 = smov [#allocation6]  }
   0x3   :  { %s17_s13 = sshll.u32 %s248_s12, 4  ;;  %s26_s15 = sshll.u32 %s249_s14, 4  ;;  %s18_s13 = int_to_ptr.vmem [resolvable:$true] %s17_s13  ;;  %s27_s15 = int_to_ptr.vmem [resolvable:$true] %s26_s15 }
   0x4   :  { %s190_s16 = scalar_lea.vmem %s18_s13, 128  ;;  %p195_p1 = scmp.lt.s32.totalorder %s18_s13, %s18_s13 }
   0x5   :  { %p191_p0 = scmp.ne.s32.totalorder %s18_s13, %s190_s16  ;;  %p196_p2 = scmp.lt.s32.totalorder %s190_s16, %s190_s16 }
   0x7   :  { %p197_p3 = por %p196_p2, %p195_p1 }
   0x9   :  { %p198_p4 = pnand %p197_p3, %p191_p0 }
   0xb   :  { %201 = shalt.err (!%p198_p4)
}
   0xc   :  { %20 = dma.hbm_to_vmem [thread:$0]  %s287_s0, 128, %s18_s13, [#allocation4]  }
   0xd   :  { %s210_s19 = scalar_lea.vmem %s27_s15, 2048  ;;  %p215_p6 = scmp.lt.s32.totalorder %s27_s15, %s27_s15 }
   0xe   :  { %p211_p5 = scmp.ne.s32.totalorder %s27_s15, %s210_s19  ;;  %p216_p7 = scmp.lt.s32.totalorder %s210_s19, %s210_s19 }
  0x10   :  { %p217_p8 = por %p216_p7, %p215_p6 }
  0x12   :  { %p218_p9 = pnand %p217_p8, %p211_p5 }
  0x14   :  { %221 = shalt.err (!%p218_p9)
}
  0x15   :  { %s250_s20 = smov 128   ;;  %s251_s21 = smov 8  }
  0x16   :  { %32 = dma.hbm_to_vmem [thread:$0]  %s288_s1, 2048, %s27_s15, [#allocation7], %s250_s20, %s250_s20, %s251_s21  }
  0x17   :  { %242 = dma.done.wait [#allocation4], 128  }
  0x18   :  { %243 = vsyncadd [#allocation4], 4294967168 }
  0x19   :  { %244 = dma.done.wait [#allocation7], 2048  }
  0x1a   :  { %245 = vsyncadd [#allocation7], 4294965248  ;;  %v252_v0 = vmov 0.0   ;;  %vm253_vm0 = vmmov 0   ;;  %v72_v1 = vld [vmem:[#allocation6 + $0x70] sm:$0xff]  ;;  %v73_v2 = vld [vmem:[#allocation6 + $0x78] sm:$0xff] }
  0x1b   :  { %155 = vmatprep.subr.bf16.mxu0 %v252_v0  ;;  %171 = vmatprep.mubr.msk.bf16.mxu0 %vm253_vm0, %v252_v0  ;;  %v70_v3 = vld [vmem:[#allocation6 + $0x60] sm:$0xff]  ;;  %v81_v4 = vpack.c.bf16 %v73_v2, %v72_v1  ;;  %v71_v5 = vld [vmem:[#allocation6 + $0x68] sm:$0xff]  ;;  %v68_v7 = vld [vmem:[#allocation6 + $0x50] sm:$0xff]  ;;  %s254_s24 = smov [#allocation8]  }
  0x1c   :  { %v80_v6 = vpack.c.bf16 %v71_v5, %v70_v3  ;;  %v69_v8 = vld [vmem:[#allocation6 + $0x58] sm:$0xff]  ;;  %v66_v10 = vld [vmem:[#allocation6 + $0x40] sm:$0xff]  ;;  %v67_v11 = vld [vmem:[#allocation6 + $0x48] sm:$0xff]  ;;  %s135_s25 = sshll.u32 %s254_s24, 4  ;;  %s136_s25 = int_to_ptr.vmem [resolvable:$true] %s135_s25 }
  0x1d   :  { %156 = vmatpush3.bf16.msra.mxu0 %v81_v4  ;;  %v79_v9 = vpack.c.bf16 %v69_v8, %v68_v7  ;;  %v78_v12 = vpack.c.bf16 %v67_v11, %v66_v10  ;;  %v64_v13 = vld [vmem:[#allocation6 + $0x30] sm:$0xff]  ;;  %v65_v14 = vld [vmem:[#allocation6 + $0x38] sm:$0xff]  ;;  %v62_v16 = vld [vmem:[#allocation6 + $0x20] sm:$0xff]  ;;  %s222_s26 = scalar_lea.vmem %s136_s25, 128  ;;  %p227_p11 = scmp.lt.s32.totalorder %s136_s25, %s136_s25 }
  0x1e   :  { %157 = vmatprep.subr.bf16.mxu0 %v252_v0  ;;  %v77_v15 = vpack.c.bf16 %v65_v14, %v64_v13  ;;  %v63_v17 = vld [vmem:[#allocation6 + $0x28] sm:$0xff]  ;;  %v60_v19 = vld [vmem:[#allocation6 + $0x10] sm:$0xff]  ;;  %v61_v20 = vld [vmem:[#allocation6 + $0x18] sm:$0xff]  ;;  %p223_p10 = scmp.ne.s32.totalorder %s136_s25, %s222_s26  ;;  %p228_p12 = scmp.lt.s32.totalorder %s222_s26, %s222_s26 }
  0x1f   :  { %v76_v18 = vpack.c.bf16 %v63_v17, %v62_v16  ;;  %v75_v21 = vpack.c.bf16 %v61_v20, %v60_v19  ;;  %v58_v22 = vld [vmem:[#allocation6] sm:$0xff]  ;;  %v59_v23 = vld [vmem:[#allocation6 + $0x8] sm:$0xff]  ;;  %v56_v25 = vld [vmem:[#allocation3] sm:$0xff] }
  0x20   :  { %v74_v24 = vpack.c.bf16 %v59_v23, %v58_v22  ;;  %v57_v26 = vpack.c.bf16 %v56_v25, %v56_v25  ;;  %v145_v27 = vld [vmem:[%s289_s2] ss:$0 sm:$0xff]  ;;  %p229_p13 = por %p228_p12, %p227_p11 }
  0x21   :  { %158 = vmatpush3.bf16.msra.mxu0 %v80_v6 }
  0x22   :  { %159 = vmatprep.subr.bf16.mxu0 %v252_v0  ;;  %p230_p0 = pnand %p229_p13, %p223_p10 }
  0x25   :  { %160 = vmatpush3.bf16.msra.mxu0 %v79_v9 }
  0x26   :  { %161 = vmatprep.subr.bf16.mxu0 %v252_v0 }
  0x29   :  { %162 = vmatpush3.bf16.msra.mxu0 %v78_v12 }
  0x2a   :  { %163 = vmatprep.subr.bf16.mxu0 %v252_v0 }
  0x2d   :  { %164 = vmatpush3.bf16.msra.mxu0 %v77_v15 }
  0x2e   :  { %165 = vmatprep.subr.bf16.mxu0 %v252_v0 }
  0x31   :  { %166 = vmatpush3.bf16.msra.mxu0 %v76_v18 }
  0x32   :  { %167 = vmatprep.subr.bf16.mxu0 %v252_v0 }
  0x35   :  { %168 = vmatpush3.bf16.msra.mxu0 %v75_v21 }
  0x36   :  { %169 = vmatprep.subr.bf16.mxu0 %v252_v0 }
  0x39   :  { %170 = vmatpush3.bf16.msra.mxu0 %v74_v24 }
  0x3c   :  { %172 = vmatmul.mubr.bf16.vlgmr.msra.gmra.mxu0 %v57_v26 }
  0xfc   :  { %v116_v28 = vpop.f32.mrf.mxu0 }
  0xfd   :  { %v122_v29 = vadd.f32 %v145_v27, %v116_v28 }
  0xfe   :  { %v173_v30 = vpop.f32.mrf.mxu0 }
  0xff   :  { %128 = vst [vmem:[#allocation8] sm:$0xff] %v122_v29 }
 0x100   :  { %v119_v31 = vpop.f32.mrf.mxu0 }
 0x101   :  { %233 = shalt.err (!%p230_p0)
}
 0x102   :  { %138 = dma.vmem_to_hbm [thread:$0]  %s136_s25, 128, %s290_s3, [#allocation5]   ;;  %v174_v32 = vpop.f32.mrf.mxu0 }
 0x103   :  { %246 = dma.done.wait [#allocation5], 128  }
 0x104   :  { %247 = vsyncadd [#allocation5], 4294967168 }
 0x105   :  { %142 = vsyncpa [#allocation4], 1 }
 0x106   :  { %143 = vsyncpa [#allocation7], 1 }
 0x107   :  { %144 = vsyncpa [#allocation5], 1 }

</bundles_post_ra>
